<compile_context>
chip_gen: v7x
topology: tpu7x:2x2x1
jax: 0.10.0
libtpu: 0.0.40
codegen_flags: <defaults>
</compile_context>

<pallas_src>
import jax
import jax.numpy as jnp
from jax.experimental import pallas as pl
from jax.experimental.pallas import tpu as pltpu

# ---------------- model configuration (small, consistent with the module) ---
FIELD_DIMS = (8, 8, 8, 8)                     # vocabulary size per field
NUM_FIELDS = len(FIELD_DIMS)
EMBED_DIM = 8
EMBED_OUT = NUM_FIELDS * EMBED_DIM            # embed_output_dim = 32
NUM_CROSS_LAYERS = 2
LOW_RANK = 4
MLP_DIMS = (32, 16)
BN_EPS = 1e-5

TOTAL_VOCAB = sum(FIELD_DIMS)                 # 32 rows in the embedding table
FVT = NUM_FIELDS * TOTAL_VOCAB                # 128 = multi-hot width / slab lanes
FIELD_OFFSETS = tuple(int(sum(FIELD_DIMS[:f])) for f in range(NUM_FIELDS))

BATCH = 512                                   # demo batch
MAX_TILE_B = 512                              # spill-safe cap (v5e)

# column layout of the bias/vector rows inside the weight slab
_COL_B1 = NUM_CROSS_LAYERS                    # cross biases live in cols 0..L-1
_COL_B2 = NUM_CROSS_LAYERS + 1
_COL_WOC = NUM_CROSS_LAYERS + 2
_COL_WOD = NUM_CROSS_LAYERS + 3
_COL_BO = NUM_CROSS_LAYERS + 4

# row layout of the single packed weight slab [_SLAB_ROWS, FVT]
_R_TAB = 0                                                  # expanded table^T
_R_MERGED = EMBED_OUT                                       # [cross0^T ; W1^T]
_R_CROSS1 = _R_MERGED + EMBED_OUT + MLP_DIMS[0]             # cross layers 1..L-1
_R_W2 = _R_CROSS1 + (NUM_CROSS_LAYERS - 1) * EMBED_OUT      # W2^T
_R_VEC = _R_W2 + MLP_DIMS[1]                                # bias/vector rows
_VEC_ROWS = max(EMBED_OUT, *MLP_DIMS)
_SLAB_ROWS = -(-(_R_VEC + _VEC_ROWS) // 8) * 8              # 176 (8-aligned)


# ---------------------------- Pallas kernel ---------------------------------
def dcn_mix_kernel(idx_ref,     # [F, TB] int32   ids for this batch tile
                   slab_ref,    # [_SLAB_ROWS, FVT] f32  packed weights
                   out_ref):    # [1, 1, TB] f32  sigmoid(logit) row
    tb = idx_ref.shape[1]
    D, H1, H2 = EMBED_OUT, MLP_DIMS[0], MLP_DIMS[1]

    # ---- fused embedding gather: per-field one-hot blocks + one MXU matmul -
    ids = idx_ref[...]                                        # [F, TB]
    row = jax.lax.broadcasted_iota(jnp.int32, (TOTAL_VOCAB, tb), 0)
    blocks = []
    for f in range(NUM_FIELDS):                               # static unroll
        # field offset folded into the [1, TB] id row (cheap), not the iota
        hit = row == (ids[f:f + 1, :] + FIELD_OFFSETS[f])
        blocks.append(hit.astype(jnp.float32))                # [32, TB]
    onehot = jnp.concatenate(blocks, axis=0)                  # [FVT, TB]
    # x0[d, b] = concat_f(emb[offset_f + id[b,f]])[d]   -> [D, TB]
    x0 = jnp.dot(slab_ref[_R_TAB:_R_TAB + D, :], onehot,
                 preferred_element_type=jnp.float32)

    # ---- bias / output vectors: slice once into named values ---------------
    vec = slab_ref[_R_VEC:_R_VEC + _VEC_ROWS, :]              # [32, 128]
    b_cross = [vec[:D, l:l + 1] for l in range(NUM_CROSS_LAYERS)]
    b1 = vec[:H1, _COL_B1:_COL_B1 + 1]
    b2 = vec[:H2, _COL_B2:_COL_B2 + 1]
    wo_c = vec[:D, _COL_WOC:_COL_WOC + 1]
    wo_d = vec[:H2, _COL_WOD:_COL_WOD + 1]
    bo = vec[0:1, _COL_BO:_COL_BO + 1]

    # ---- merged first matmul: [cross0^T ; W1^T] @ x0 (shared RHS) ----------
    m0 = jnp.dot(slab_ref[_R_MERGED:_R_MERGED + D + H1, 0:D], x0,
                 preferred_element_type=jnp.float32)          # [D+H1, TB]
    # cross layer 0: x1 = x0 * (W0 x0 + b0) + x0
    xc = x0 * (m0[:D, :] + b_cross[0]) + x0
    # MLP layer 1: Linear -> BN(eval, folded) -> ReLU -> Dropout(identity)
    h = jnp.maximum(m0[D:D + H1, :] + b1, 0.0)

    # ---- remaining cross layers: x_{l+1} = x0 * (W_l x_l + b_l) + x_l ------
    for l in range(1, NUM_CROSS_LAYERS):                      # static unroll
        w_t = slab_ref[_R_CROSS1 + (l - 1) * D:_R_CROSS1 + l * D, 0:D]
        xc = x0 * (jnp.dot(w_t, xc, preferred_element_type=jnp.float32)
                   + b_cross[l]) + xc

    # ---- MLP layer 2 --------------------------------------------------------
    h = jnp.maximum(jnp.dot(slab_ref[_R_W2:_R_W2 + H2, 0:H1], h,
                            preferred_element_type=jnp.float32) + b2, 0.0)

    # ---- final Linear over concat([cross, deep]): mul + sublane reduce -----
    logit = (jnp.sum(xc * wo_c, axis=0, keepdims=True)
             + jnp.sum(h * wo_d, axis=0, keepdims=True)
             + bo)                                            # [1, TB]
    out_ref[...] = jax.nn.sigmoid(logit)[None, :, :]          # lane-dense row


# ------------------------------ wrapper --------------------------------------
def _choose_tile_b(batch):
    """Batch tile: multiple of 128, ~2 grid steps (2 v7x TCs), capped at 512."""
    half = -(-batch // 2)                   # cdiv(batch, 2)
    tile = -(-half // 128) * 128            # round up to a multiple of 128
    return max(128, min(MAX_TILE_B, tile))


def dcn_mix_forward(x_ids, slab):
    """x_ids: [B, NUM_FIELDS] int32 -> probabilities [B, 1] float32."""
    b = x_ids.shape[0]
    tile_b = _choose_tile_b(b)
    nt = pl.cdiv(b, tile_b)
    bp = nt * tile_b

    ids_t = jnp.transpose(x_ids.astype(jnp.int32))            # [F, B] plumbing
    if bp != b:
        ids_t = jnp.pad(ids_t, ((0, 0), (0, bp - b)))         # pad batch tile

    out = pl.pallas_call(
        dcn_mix_kernel,
        out_shape=jax.ShapeDtypeStruct((nt, 1, tile_b), jnp.float32),
        grid=(nt,),
        in_specs=[
            pl.BlockSpec((NUM_FIELDS, tile_b), lambda i: (0, i)),
            pl.BlockSpec(slab.shape, lambda i: (0, 0)),       # VMEM resident
        ],
        out_specs=pl.BlockSpec((1, 1, tile_b), lambda i: (i, 0, 0)),
        compiler_params=pltpu.CompilerParams(
            dimension_semantics=("parallel",)),               # v7x: 2 TCs
    )(ids_t, slab)
    return out.reshape(bp, 1)[:b]


# ------------------------ parameter init & packing ---------------------------
def init_params(key):
    """Raw parameters mirroring the PyTorch module (all float32)."""
    D, R, H1, H2 = EMBED_OUT, LOW_RANK, MLP_DIMS[0], MLP_DIMS[1]
    keys = jax.random.split(key, 10)

    def uni(k, shape, fan_in):
        bound = 1.0 / float(fan_in) ** 0.5
        return jax.random.uniform(k, shape, jnp.float32, -bound, bound)

    return {
        "emb": uni(keys[0], (TOTAL_VOCAB, EMBED_DIM), EMBED_DIM),
        "cu": uni(keys[1], (NUM_CROSS_LAYERS, D, R), D),      # down-projection
        "cv": uni(keys[2], (NUM_CROSS_LAYERS, R, D), R),      # up-projection
        "cb": uni(keys[3], (NUM_CROSS_LAYERS, D), D),         # cross bias
        "w1": uni(keys[4], (D, H1), D),
        "b1": uni(keys[5], (H1,), D),
        "w2": uni(keys[6], (H1, H2), H1),
        "b2": uni(keys[7], (H2,), H1),
        "wo": uni(keys[8], (D + H2, 1), D + H2),
        "bo": uni(keys[9], (1,), D + H2),
    }


def pack_params(raw):
    """Trace-time packing: table expansion, U@V fusion, BN fold, one VMEM slab."""
    D, H1, H2 = EMBED_OUT, MLP_DIMS[0], MLP_DIMS[1]

    def pad_cols(m):
        return jnp.pad(m, ((0, 0), (0, FVT - m.shape[1])))

    # block-diagonal expansion of the embedding table, transposed: [D, F*V]
    tab = jnp.zeros((FVT, D), jnp.float32)
    for f in range(NUM_FIELDS):
        tab = tab.at[f * TOTAL_VOCAB:(f + 1) * TOTAL_VOCAB,
                     f * EMBED_DIM:(f + 1) * EMBED_DIM].set(raw["emb"])
    tab_t = jnp.transpose(tab)                                # [D, FVT]

    # BatchNorm1d eval with default running stats (mean=0, var=1, gamma=1,
    # beta=0) folded into the Linear layers.
    bn_s = 1.0 / jnp.sqrt(jnp.float32(1.0 + BN_EPS))
    w1f, b1f = raw["w1"] * bn_s, raw["b1"] * bn_s
    w2f, b2f = raw["w2"] * bn_s, raw["b2"] * bn_s

    # low-rank cross fused: W_l = U_l @ V_l (exact, no activation in between)
    cross_t = [jnp.transpose(raw["cu"][l] @ raw["cv"][l])
               for l in range(NUM_CROSS_LAYERS)]

    # matrix rows: merged [cross0^T ; W1^T] (shared RHS x0), remaining cross
    # layers, then W2^T; every block padded to the 128-lane slab width.
    wrows = [cross_t[0], jnp.transpose(w1f)] + cross_t[1:] + [jnp.transpose(w2f)]
    wmats = jnp.concatenate([pad_cols(m) for m in wrows], axis=0)

    # bias / output-vector rows
    vecs = jnp.zeros((_VEC_ROWS, FVT), jnp.float32)
    for l in range(NUM_CROSS_LAYERS):
        vecs = vecs.at[:D, l].set(raw["cb"][l])
    vecs = vecs.at[:H1, _COL_B1].set(b1f)
    vecs = vecs.at[:H2, _COL_B2].set(b2f)
    vecs = vecs.at[:D, _COL_WOC].set(raw["wo"][:D, 0])
    vecs = vecs.at[:H2, _COL_WOD].set(raw["wo"][D:, 0])
    vecs = vecs.at[0, _COL_BO].set(raw["bo"][0])

    slab = jnp.concatenate([tab_t, wmats, vecs], axis=0)      # [176, 128]
    pad_rows = _SLAB_ROWS - slab.shape[0]
    if pad_rows:
        slab = jnp.pad(slab, ((0, pad_rows), (0, 0)))
    return slab


# ------------------------- pure-JAX reference --------------------------------
def reference_forward(x_ids, raw):
    offsets = jnp.asarray(FIELD_OFFSETS, jnp.int32)
    e = jnp.take(raw["emb"], x_ids + offsets[None, :], axis=0)    # [B, F, E]
    x0 = e.reshape(x_ids.shape[0], EMBED_OUT)
    xc = x0
    for l in range(NUM_CROSS_LAYERS):
        up = (xc @ raw["cu"][l]) @ raw["cv"][l]
        xc = x0 * (up + raw["cb"][l][None, :]) + xc
    s = 1.0 / jnp.sqrt(1.0 + BN_EPS)
    h = jnp.maximum((x0 @ raw["w1"] + raw["b1"][None, :]) * s, 0.0)
    h = jnp.maximum((h @ raw["w2"] + raw["b2"][None, :]) * s, 0.0)
    stacked = jnp.concatenate([xc, h], axis=1)
    return jax.nn.sigmoid(stacked @ raw["wo"] + raw["bo"][None, :])


# ---------------------------------- main --------------------------------------
if __name__ == "__main__":
    key = jax.random.PRNGKey(0)
    pkey, xkey = jax.random.split(key)
    raw = init_params(pkey)
    slab = pack_params(raw)

    # categorical ids per field: [batch, num_fields]
    id_keys = jax.random.split(xkey, NUM_FIELDS)
    x = jnp.stack(
        [jax.random.randint(k, (BATCH,), 0, d, dtype=jnp.int32)
         for k, d in zip(id_keys, FIELD_DIMS)],
        axis=1,
    )

    out = jax.block_until_ready(dcn_mix_forward(x, slab))    # [B, 1]
    ref = reference_forward(x, raw)

    assert out.shape == (BATCH, 1)
    assert bool(jnp.all((out >= 0.0) & (out <= 1.0)))
    assert bool(jnp.allclose(out, ref, atol=1e-5, rtol=1e-4))
    print("KERNEL_OK")
</pallas_src>

<mosaic_0001>
module attributes {stable_mosaic.version = 11 : i64} {
  func.func @dcn_mix_kernel(%arg0: i32, %arg1: memref<4x256xi32, #tpu.memory_space<vmem>>, %arg2: memref<176x128xf32, #tpu.memory_space<vmem>>, %arg3: memref<1x1x256xf32, #tpu.memory_space<vmem>>) attributes {dimension_semantics = [#tpu.dimension_semantics<parallel>], iteration_bounds = array<i64: 2>, scalar_prefetch = 0 : i64, scratch_operands = 0 : i64, tpu.core_type = #tpu.core_type<tc>, window_params = [{transform_indices = @transform_0, window_bounds = array<i64: 4, 256>}, {pipeline_mode = #tpu.pipeline_mode<synchronous>, transform_indices = @transform_1, window_bounds = array<i64: 176, 128>}, {transform_indices = @transform_2, window_bounds = array<i64: 1, 1, 256>}]} {
    %c0 = arith.constant 0 : index
    %c0_0 = arith.constant 0 : index
    %0 = vector.load %arg1[%c0, %c0_0] : memref<4x256xi32, #tpu.memory_space<vmem>>, vector<4x256xi32>
    %1 = tpu.iota {dimensions = array<i32: 0>} : vector<32x256xi32>
    %2 = vector.extract_strided_slice %0 {offsets = [0, 0], sizes = [1, 256], strides = [1, 1]} : vector<4x256xi32> to vector<1x256xi32>
    %c0_i32 = arith.constant 0 : i32
    %3 = vector.broadcast %c0_i32 : i32 to vector<1x256xi32>
    %4 = arith.addi %2, %3 : vector<1x256xi32>
    %5 = vector.broadcast %4 : vector<1x256xi32> to vector<32x256xi32>
    %6 = arith.cmpi eq, %1, %5 : vector<32x256xi32>
    %7 = arith.extui %6 : vector<32x256xi1> to vector<32x256xi32>
    %8 = arith.sitofp %7 : vector<32x256xi32> to vector<32x256xf32>
    %9 = vector.extract_strided_slice %0 {offsets = [1, 0], sizes = [1, 256], strides = [1, 1]} : vector<4x256xi32> to vector<1x256xi32>
    %c8_i32 = arith.constant 8 : i32
    %10 = vector.broadcast %c8_i32 : i32 to vector<1x256xi32>
    %11 = arith.addi %9, %10 : vector<1x256xi32>
    %12 = vector.broadcast %11 : vector<1x256xi32> to vector<32x256xi32>
    %13 = arith.cmpi eq, %1, %12 : vector<32x256xi32>
    %14 = arith.extui %13 : vector<32x256xi1> to vector<32x256xi32>
    %15 = arith.sitofp %14 : vector<32x256xi32> to vector<32x256xf32>
    %16 = vector.extract_strided_slice %0 {offsets = [2, 0], sizes = [1, 256], strides = [1, 1]} : vector<4x256xi32> to vector<1x256xi32>
    %c16_i32 = arith.constant 16 : i32
    %17 = vector.broadcast %c16_i32 : i32 to vector<1x256xi32>
    %18 = arith.addi %16, %17 : vector<1x256xi32>
    %19 = vector.broadcast %18 : vector<1x256xi32> to vector<32x256xi32>
    %20 = arith.cmpi eq, %1, %19 : vector<32x256xi32>
    %21 = arith.extui %20 : vector<32x256xi1> to vector<32x256xi32>
    %22 = arith.sitofp %21 : vector<32x256xi32> to vector<32x256xf32>
    %23 = vector.extract_strided_slice %0 {offsets = [3, 0], sizes = [1, 256], strides = [1, 1]} : vector<4x256xi32> to vector<1x256xi32>
    %c24_i32 = arith.constant 24 : i32
    %24 = vector.broadcast %c24_i32 : i32 to vector<1x256xi32>
    %25 = arith.addi %23, %24 : vector<1x256xi32>
    %26 = vector.broadcast %25 : vector<1x256xi32> to vector<32x256xi32>
    %27 = arith.cmpi eq, %1, %26 : vector<32x256xi32>
    %28 = arith.extui %27 : vector<32x256xi1> to vector<32x256xi32>
    %29 = arith.sitofp %28 : vector<32x256xi32> to vector<32x256xf32>
    %30 = tpu.concatenate %8, %15, %22, %29 in 0 : vector<32x256xf32>, vector<32x256xf32>, vector<32x256xf32>, vector<32x256xf32> -> vector<128x256xf32>
    %c0_1 = arith.constant 0 : index
    %c0_2 = arith.constant 0 : index
    %31 = vector.load %arg2[%c0_1, %c0_2] : memref<176x128xf32, #tpu.memory_space<vmem>>, vector<32x128xf32>
    %cst = arith.constant dense<0.000000e+00> : vector<32x256xf32>
    %32 = tpu.matmul %31, %30, %cst {dimension_numbers = #tpu.dot_dimension_numbers<[1], [0], [0], [1], [0, 0, 1, 1], [], []>} : vector<32x128xf32>, vector<128x256xf32>, vector<32x256xf32> -> vector<32x256xf32>
    %c144 = arith.constant 144 : index
    %c0_3 = arith.constant 0 : index
    %33 = vector.load %arg2[%c144, %c0_3] : memref<176x128xf32, #tpu.memory_space<vmem>>, vector<32x128xf32>
    %34 = vector.extract_strided_slice %33 {offsets = [0, 0], sizes = [32, 1], strides = [1, 1]} : vector<32x128xf32> to vector<32x1xf32>
    %35 = vector.extract_strided_slice %33 {offsets = [0, 1], sizes = [32, 1], strides = [1, 1]} : vector<32x128xf32> to vector<32x1xf32>
    %36 = vector.extract_strided_slice %33 {offsets = [0, 2], sizes = [32, 1], strides = [1, 1]} : vector<32x128xf32> to vector<32x1xf32>
    %37 = vector.extract_strided_slice %33 {offsets = [0, 3], sizes = [16, 1], strides = [1, 1]} : vector<32x128xf32> to vector<16x1xf32>
    %38 = vector.extract_strided_slice %33 {offsets = [0, 4], sizes = [32, 1], strides = [1, 1]} : vector<32x128xf32> to vector<32x1xf32>
    %39 = vector.extract_strided_slice %33 {offsets = [0, 5], sizes = [16, 1], strides = [1, 1]} : vector<32x128xf32> to vector<16x1xf32>
    %40 = vector.extract_strided_slice %33 {offsets = [0, 6], sizes = [1, 1], strides = [1, 1]} : vector<32x128xf32> to vector<1x1xf32>
    %c32 = arith.constant 32 : index
    %c0_4 = arith.constant 0 : index
    %41 = vector.load %arg2[%c32, %c0_4] : memref<176x128xf32, #tpu.memory_space<vmem>>, vector<64x32xf32>
    %cst_5 = arith.constant dense<0.000000e+00> : vector<64x256xf32>
    %42 = tpu.matmul %41, %32, %cst_5 {dimension_numbers = #tpu.dot_dimension_numbers<[1], [0], [0], [1], [0, 0, 1, 1], [], []>} : vector<64x32xf32>, vector<32x256xf32>, vector<64x256xf32> -> vector<64x256xf32>
    %43 = vector.extract_strided_slice %42 {offsets = [0, 0], sizes = [32, 256], strides = [1, 1]} : vector<64x256xf32> to vector<32x256xf32>
    %44 = vector.broadcast %34 : vector<32x1xf32> to vector<32x256xf32>
    %45 = arith.addf %43, %44 : vector<32x256xf32>
    %46 = arith.mulf %32, %45 : vector<32x256xf32>
    %47 = arith.addf %46, %32 : vector<32x256xf32>
    %48 = vector.extract_strided_slice %42 {offsets = [32, 0], sizes = [32, 256], strides = [1, 1]} : vector<64x256xf32> to vector<32x256xf32>
    %49 = vector.broadcast %36 : vector<32x1xf32> to vector<32x256xf32>
    %50 = arith.addf %48, %49 : vector<32x256xf32>
    %cst_6 = arith.constant 0.000000e+00 : f32
    %51 = vector.broadcast %cst_6 : f32 to vector<32x256xf32>
    %52 = arith.maximumf %50, %51 : vector<32x256xf32>
    %c96 = arith.constant 96 : index
    %c0_7 = arith.constant 0 : index
    %53 = vector.load %arg2[%c96, %c0_7] : memref<176x128xf32, #tpu.memory_space<vmem>>, vector<32x32xf32>
    %cst_8 = arith.constant dense<0.000000e+00> : vector<32x256xf32>
    %54 = tpu.matmul %53, %47, %cst_8 {dimension_numbers = #tpu.dot_dimension_numbers<[1], [0], [0], [1], [0, 0, 1, 1], [], []>} : vector<32x32xf32>, vector<32x256xf32>, vector<32x256xf32> -> vector<32x256xf32>
    %55 = vector.broadcast %35 : vector<32x1xf32> to vector<32x256xf32>
    %56 = arith.addf %54, %55 : vector<32x256xf32>
    %57 = arith.mulf %32, %56 : vector<32x256xf32>
    %58 = arith.addf %57, %47 : vector<32x256xf32>
    %c128 = arith.constant 128 : index
    %c0_9 = arith.constant 0 : index
    %59 = vector.load %arg2[%c128, %c0_9] : memref<176x128xf32, #tpu.memory_space<vmem>>, vector<16x32xf32>
    %cst_10 = arith.constant dense<0.000000e+00> : vector<16x256xf32>
    %60 = tpu.matmul %59, %52, %cst_10 {dimension_numbers = #tpu.dot_dimension_numbers<[1], [0], [0], [1], [0, 0, 1, 1], [], []>} : vector<16x32xf32>, vector<32x256xf32>, vector<16x256xf32> -> vector<16x256xf32>
    %61 = vector.broadcast %37 : vector<16x1xf32> to vector<16x256xf32>
    %62 = arith.addf %60, %61 : vector<16x256xf32>
    %cst_11 = arith.constant 0.000000e+00 : f32
    %63 = vector.broadcast %cst_11 : f32 to vector<16x256xf32>
    %64 = arith.maximumf %62, %63 : vector<16x256xf32>
    %65 = vector.broadcast %38 : vector<32x1xf32> to vector<32x256xf32>
    %66 = arith.mulf %58, %65 : vector<32x256xf32>
    %cst_12 = arith.constant dense<0.000000e+00> : vector<256xf32>
    %67 = vector.multi_reduction <add>, %66, %cst_12 [0] : vector<32x256xf32> to vector<256xf32>
    %68 = vector.shape_cast %67 : vector<256xf32> to vector<1x256xf32>
    %69 = vector.broadcast %39 : vector<16x1xf32> to vector<16x256xf32>
    %70 = arith.mulf %64, %69 : vector<16x256xf32>
    %cst_13 = arith.constant dense<0.000000e+00> : vector<256xf32>
    %71 = vector.multi_reduction <add>, %70, %cst_13 [0] : vector<16x256xf32> to vector<256xf32>
    %72 = vector.shape_cast %71 : vector<256xf32> to vector<1x256xf32>
    %73 = arith.addf %68, %72 : vector<1x256xf32>
    %74 = vector.broadcast %40 : vector<1x1xf32> to vector<1x256xf32>
    %75 = arith.addf %73, %74 : vector<1x256xf32>
    %76 = arith.negf %75 : vector<1x256xf32>
    %77 = math.exp %76 : vector<1x256xf32>
    %cst_14 = arith.constant 1.000000e+00 : f32
    %78 = vector.broadcast %cst_14 : f32 to vector<1x256xf32>
    %79 = arith.addf %78, %77 : vector<1x256xf32>
    %80 = arith.divf %78, %79 : vector<1x256xf32>
    %81 = vector.shape_cast %80 : vector<1x256xf32> to vector<1x1x256xf32>
    %c0_15 = arith.constant 0 : index
    %c0_16 = arith.constant 0 : index
    %c0_17 = arith.constant 0 : index
    %82 = vector.load %arg3[%c0_15, %c0_16, %c0_17] : memref<1x1x256xf32, #tpu.memory_space<vmem>>, vector<1x1x256xf32>
    tpu.vector_store %arg3[%c0_15, %c0_16, %c0_17], %81 {strides = array<i32>} : memref<1x1x256xf32, #tpu.memory_space<vmem>>, vector<1x1x256xf32>,
    return
  }
  func.func @transform_0(%arg0: i32) -> (i32, i32) {
    %c0_i32 = arith.constant 0 : i32
    %c0_i32_0 = arith.constant 0 : i32
    return %c0_i32, %arg0 : i32, i32
  }
  func.func @transform_1(%arg0: i32) -> (i32, i32) {
    %c0_i32 = arith.constant 0 : i32
    %c0_i32_0 = arith.constant 0 : i32
    %c0_i32_1 = arith.constant 0 : i32
    return %c0_i32, %c0_i32_0 : i32, i32
  }
  func.func @transform_2(%arg0: i32) -> (i32, i32, i32) {
    %c0_i32 = arith.constant 0 : i32
    %c0_i32_0 = arith.constant 0 : i32
    %c0_i32_1 = arith.constant 0 : i32
    return %arg0, %c0_i32, %c0_i32_0 : i32, i32, i32
  }
}

</mosaic_0001>

<bundles_post_ra>
// kernel: tpu_custom_call.1
= control target key start
LH: loop header
LB: loop body
LE: loop exit
PB: predicated region body
PF: predicated region fallthrough
CT: control target
= control target key end

     0   :  { %7 = vsyncpa [#allocation3], 0  ;;  %s1917_s0 = inlined_call_operand.hbm [shape: s32[4,512], index: 0, kind: input, shape index: {}]   ;;  %s1918_s1 = inlined_call_operand.hbm [shape: f32[176,128], index: 1, kind: input, shape index: {}]   ;;  %s1919_s2 = inlined_call_operand.hbm [shape: f32[2,1,256], index: 2, kind: output, shape index: {}]  }
   0x1   :  { %9 = vsyncpa [#allocation3 + $0x1], 0 }
   0x2   :  { %10 = vsyncpa [#allocation6], 0 }
   0x3   :  { %11 = vsyncpa [#allocation4], 0 }
   0x4   :  { %13 = vsyncpa [#allocation4 + $0x1], 0  ;;  %s1509_s9 = smov 0   ;;  %s1511_s10 = smov 0  }
   0x5   :  { %s1513_s11 = smov 0   ;;  %s1515_s12 = smov 0  }
   0x6 LB: > { %s1530_s13 = sadd.s32 4294967295, %s1477_s12   ;;  %s1104_s14 = sadd.s32 4294967294, %s1477_s12   ;;  %s1477_s12 = sphi %s1515_s12, %s1939_s12   ;;  %s1473_s11 = sphi %s1513_s11, %s1938_s11   ;;  %s1469_s10 = sphi %s1511_s10, %s1937_s10   ;;  %s1465_s9 = sphi %s1509_s9, %s1936_s9  }
   0x7   : > { %p39_p0 = scmp.ne.s32.totalorder %s1469_s10, %s1465_s9  ;;  %p1920_p1 = scmp.eq.s32.totalorder %s1530_s13, 0 }
   0x8   : > { %p90_p3 = scmp.eq.s32.totalorder %s1104_s14, 1  ;;  %p1105_p5 = scmp.ge.s32.totalorder %s1477_s12, 1 }
   0x9   : > { %p1539_p4 = por %p1920_p1, %p39_p0  ;;  %p97_p7 = scmp.lt.s32.totalorder %s1477_s12, 3 }
   0xa   : > { %p1544_p6 = por %p90_p3, %p39_p0  ;;  %s1479_s18 = smov [#allocation5]  }
   0xb   : > { %s1923_s15 = scalar_select %p1539_p4, 1, 0 }
   0xc   : > { %s1924_s16 = scalar_select %p1544_p6, 1, 0 }
   0xd   : > { %p1549_p8 = pnand %p1105_p5, %p97_p7  ;;  %s109_s19 = sshll.u32 %s1479_s18, 4  ;;  %s1553_s19 = int_to_ptr.vmem [resolvable:$true] %s109_s19 }
   0xe   : > { %s1565_s21 = sadd.s32 1, %s1477_s12   ;;  %s26_s22 = sadd.s32 1, %s1473_s11 }
   0xf   : > { %s1925_s17 = scalar_select %p1549_p8, 1, 0 }
  0x10   : > { %p1266_p9 = pneg %p1549_p8  ;;  %s23_s23 = ssub.s32 %s1477_s12, %s1565_s21 }
  0x11   : > { %s1349_s26 = scalar_lea.hbm %s1918_s1, 2816 }
  0x12   : > { %p1560_p11 = pnand %p1266_p9, %p1920_p1  ;;  %p1350_p12 = scmp.ne.s32.totalorder %s1918_s1, %s1349_s26 }
  0x13   : > { %p1356_p5 = scmp.lt.u32.totalorder %s1349_s26, %s1918_s1 }
  0x14   : > { %p1351_p13 = pneg %p1560_p11 }
  0x16   : > { %p1352_p0 = pnand %p1351_p13, %p1350_p12 }
  0x18   : > { %p1353_p3 = pneg %p1352_p0 }
  0x1a   : > { %p1358_p7 = pnand %p1356_p5, %p1353_p3 }
  0x1c   : > { %1361 = shalt.err (!%p1358_p7)
}
  0x1d   : > { %s1362_s3 = scalar_lea.vmem %s1553_s19, 2816  ;;  %p1370_p2 = scmp.lt.s32.totalorder %s1553_s19, %s1553_s19 }
  0x1e   : > { %p1363_p9 = scmp.ne.s32.totalorder %s1553_s19, %s1362_s3  ;;  %p1371_p6 = scmp.lt.s32.totalorder %s1362_s3, %s1362_s3 }
  0x20   : > { %p1365_p10 = pnand %p1363_p9, %p1351_p13  ;;  %p1372_p4 = por %p1371_p6, %p1370_p2 }
  0x22   : > { %p1366_p1 = pneg %p1365_p10 }
  0x24   : > { %p1373_p8 = pnand %p1372_p4, %p1366_p1 }
  0x26   : > { %1376 = shalt.err (!%p1373_p8)
}
  0x27   : > { %s1480_s4 = smov 128   ;;  %s1481_s5 = smov 8  }
  0x28   : > { %1269 = dma.hbm_to_vmem [thread:$0]  (!%p1560_p11), %s1918_s1, 2816, %s1553_s19, [#allocation6], %s1480_s4, %s1480_s4, %s1481_s5  }
  0x29   : > { %p24_p2 = scmp.eq.s32.totalorder %s23_s23, 0  ;;  %p33_p1 = scmp.ne.s32.totalorder %s1473_s11, %s1469_s10 }
  0x2a   : > { %p34_p4 = scmp.eq.s32.totalorder %s1477_s12, 0  ;;  %p1279_p6 = scmp.lt.s32.totalorder %s1477_s12, 2 }
  0x2b   : > { %s1596_s8 = scalar_select %p24_p2, %s1473_s11, %s26_s22  }
  0x2c   : > { %p35_p8 = por %p34_p4, %p33_p1  ;;  %p1927_p10 = scmp.eq.s32.totalorder %s1530_s13, 1 }
  0x2d   : > { %s123_s18 = sand.u32 1, %s1473_s11   ;;  %s1200_s24 = sshll.u32 %s1477_s12, 7 }
  0x2e   : > { %p1600_p12 = por %p1927_p10, %p33_p1  ;;  %s1108_s25 = sshll.u32 %s123_s18, 3 }
  0x2f   : > { %s1609_s27 = scalar_lea.hbm %s1917_s0, %s1200_s24  ;;  %s127_s19 = scalar_lea.vmem [#allocation2], %s1108_s25 }
  0x30   : > { %s135_s22 = sshll.u32 %s127_s19, 4  ;;  %p1611_p11 = pnand %p1279_p6, %p35_p8  ;;  %s1615_s22 = int_to_ptr.vmem [resolvable:$true] %s135_s22 }
  0x31   : > { %s124_s28 = scalar_lea.sflag [#allocation3], %s123_s18  ;;  %s1377_s29 = scalar_lea.hbm %s1609_s27, 128 }
  0x32   : > { %p1378_p13 = scmp.ne.s32.totalorder %s1609_s27, %s1377_s29  ;;  %p1379_p0 = pneg %p1611_p11 }
  0x33   : > { %s1382_s4 = scalar_lea.hbm %s1917_s0, 256  ;;  %p1383_p7 = scmp.lt.u32.totalorder %s1609_s27, %s1917_s0 }
  0x34   : > { %p1380_p3 = pnand %p1379_p0, %p1378_p13  ;;  %p1384_p9 = scmp.lt.u32.totalorder %s1382_s4, %s1377_s29 }
  0x35   : > { %p1386_p1 = scmp.lt.u32.totalorder %s1377_s29, %s1609_s27 }
  0x36   : > { %p1381_p5 = pneg %p1380_p3  ;;  %p1385_p2 = por %p1384_p9, %p1383_p7 }
  0x38   : > { %p1387_p4 = por %p1386_p1, %p1385_p2 }
  0x3a   : > { %p1388_p6 = pnand %p1387_p4, %p1381_p5 }
  0x3c   : > { %1391 = shalt.err (!%p1388_p6)
}
  0x3d   : > { %s1392_s7 = scalar_lea.vmem %s1615_s22, 128  ;;  %s1482_s18 = smov [#allocation2]  }
  0x3e   : > { %p1393_p8 = scmp.ne.s32.totalorder %s1615_s22, %s1392_s7  ;;  %s1397_s24 = sshll.u32 %s1482_s18, 4  ;;  %s1398_s24 = int_to_ptr.vmem [resolvable:$false] %s1397_s24 }
  0x3f   : > { %s1399_s25 = scalar_lea.vmem %s1398_s24, 256  ;;  %p1400_p3 = scmp.lt.s32.totalorder %s1615_s22, %s1398_s24 }
  0x40   : > { %p1395_p10 = pnand %p1393_p8, %p1379_p0  ;;  %p1401_p7 = scmp.lt.s32.totalorder %s1399_s25, %s1392_s7 }
  0x42   : > { %p1396_p13 = pneg %p1395_p10  ;;  %p1402_p9 = por %p1401_p7, %p1400_p3 }
  0x44   : > { %p1403_p2 = pnand %p1402_p9, %p1396_p13 }
  0x46   : > { %1406 = shalt.err (!%p1403_p2)
}
  0x47   : > { %1273 = dma.hbm_to_vmem [thread:$0]  (!%p1611_p11), %s1609_s27, 128, %s1615_s22, %s124_s28  }
  0x48   : > { %p1930_p5 = scmp.ne.s32.totalorder %s1925_s17, 0 }
  0x49   : > { %s1645_s20 = sand.u32 (!%p1930_p5), 1, %s1469_s10   ;;  %p1931_p0 = scmp.ne.s32.totalorder (!%p1930_p5), %s1923_s15, 0 }
  0x4a   : > { %144 = sbr.rel (%p1930_p5) target bundleno = 898 (0x382), region = 28  ;;  %s1112_s26 = sshll.u32 (!%p1930_p5), %s1645_s20, 3 }
  0x4b   : > { %s147_s19 = scalar_lea.sflag (!%p1930_p5), [#allocation3], %s1645_s20  ;;  %s150_s29 = scalar_lea.vmem (!%p1930_p5), [#allocation2], %s1112_s26 }
  0x51   : > { %1452 = dma.done.wait (%p1931_p0), %s147_s19, 128  }
  0x52   : > { %1454 = vsyncadd (%p1931_p0), %s147_s19, 4294967168  ;;  %p1932_p1 = scmp.eq.s32.totalorder %s1530_s13, 0 }
  0x54   : > { %1456 = dma.done.wait (%p1932_p1), [#allocation6], 2816   ;;  %p1933_p11 = pmov %p1932_p1 }
  0x55   : > { %v177_v0 = vlaneseq  ;;  %v1483_v1 = vmov 0.0   ;;  %v176_v7 = vld [vmem:[%s150_s29] sm:$0xff]  ;;  %v1484_v21 = vmov 1.0|1.0   ;;  %v345_v35 = vld [vmem:[#allocation5] sm:$0xff]  ;;  %v346_v36 = vld [vmem:[#allocation5 + $0x8] sm:$0xff] }
  0x56   : > { %1458 = vsyncadd (%p1933_p11), [#allocation6], 4294964480  ;;  %413 = vmatprep.mubr.f32.mxu0 %v1483_v1  ;;  %539 = vmatprep.mubr.f32.mxu1 %v1483_v1  ;;  %v222_v11 = vadd.s32 8, %v176_v7  ;;  %v263_v14 = vadd.s32 16, %v176_v7  ;;  %v304_v28 = vadd.s32 24, %v176_v7  ;;  %v347_v37 = vld [vmem:[#allocation5 + $0x10] sm:$0xff] }
  0x57   : > { %v1660_v2 = vshrl.u32 %v177_v0, 7  ;;  %v348_v38 = vld [vmem:[#allocation5 + $0x18] sm:$0xff]  ;;  %v1731_v39 = vld [vmem:[#allocation5 + $0x90] sm:$0xff]  ;;  %v1733_v40 = vld [vmem:[#allocation5 + $0xa0] sm:$0xff]  ;;  %v1485_v41 = vmov 0   ;;  %v1486_v44 = vmov 2  }
  0x58   : > { %1327 = vset.pattern.permute.xlu0 %v1485_v41  ;;  %1328 = vset.pattern.permute.xlu1 %v1485_v41  ;;  %v1737_v42 = vld [vmem:[#allocation5 + $0x98] sm:$0xff]  ;;  %v1739_v43 = vld [vmem:[#allocation5 + $0xa8] sm:$0xff]  ;;  %v442_v57 = vld [vmem:[#allocation5 + $0x20] sm:$0xff]  ;;  %s1114_s15 = sshll.u32 %s1645_s20, 1  ;;  %s1201_s17 = sshll.u32 %s1530_s13, 5 }
  0x59   : > { %v184_v3 = vsub.s32 0, %v1660_v2  ;;  %v188_v4 = vsub.s32 4, %v1660_v2  ;;  %v225_v5 = vsub.s32 1, %v1660_v2  ;;  %v229_v6 = vsub.s32 5, %v1660_v2  ;;  %590 = vperm.xlu0 %1327, %v1731_v39   ;;  %600 = vperm.xlu1 %1328, %v1733_v40   ;;  %v443_v58 = vld [vmem:[#allocation5 + $0x28] sm:$0xff]  ;;  %v444_v59 = vld [vmem:[#allocation5 + $0x30] sm:$0xff]  ;;  %s1873_s30 = scalar_lea.hbm %s1919_s2, %s1201_s17 }
  0x5a   : > { %v1667_v8 = vadd.s32 8, %v1660_v2  ;;  %v1670_v12 = vadd.s32 16, %v1660_v2  ;;  %v1673_v13 = vadd.s32 24, %v1660_v2  ;;  %v270_v15 = vsub.s32 6, %v1660_v2  ;;  %v445_v60 = vld [vmem:[#allocation5 + $0x38] sm:$0xff]  ;;  %v446_v61 = vld [vmem:[#allocation5 + $0x40] sm:$0xff] }
  0x5b   : > { %v189_v9 = vrot.slane %v176_v7, %v188_v4  ;;  %v185_v10 = vrot.slane %v176_v7, %v184_v3  ;;  %v230_v18 = vrot.slane %v222_v11, %v229_v6  ;;  %v226_v19 = vrot.slane %v222_v11, %v225_v5  ;;  %v447_v62 = vld [vmem:[#allocation5 + $0x48] sm:$0xff]  ;;  %v448_v63 = vld [vmem:[#allocation5 + $0x50] sm:$0xff]  ;;  %s174_s27 = scalar_lea.vmem [#allocation7], %s1114_s15  ;;  %s1010_s3 = scalar_lea.sflag [#allocation4], %s1645_s20 }
  0x5c   : > { %v266_v20 = vsub.s32 2, %v1660_v2  ;;  %v271_v24 = vrot.slane %v263_v14, %v270_v15  ;;  %v311_v26 = vsub.s32 7, %v1660_v2  ;;  %v307_v30 = vsub.s32 3, %v1660_v2  ;;  %s1024_s22 = sshll.u32 %s174_s27, 4  ;;  %s1493_s13 = smov [#allocation7]   ;;  %s1875_s22 = int_to_ptr.vmem [resolvable:$true] %s1024_s22 }
  0x5d   : > { %v197_v16 = vrot.slane %v189_v9, %v184_v3  ;;  %v193_v17 = vrot.slane %v185_v10, %v184_v3  ;;  %v238_v22 = vrot.slane %v230_v18, %v225_v5  ;;  %v234_v23 = vrot.slane %v226_v19, %v225_v5  ;;  %595 = vperm.xlu0 %1327, %v1737_v42   ;;  %v449_v3 = vld [vmem:[#allocation5 + $0x58] sm:$0xff]  ;;  %s1407_s4 = scalar_lea.vmem %s1875_s22, 32  ;;  %s1411_s5 = sshll.u32 %s1493_s13, 4  ;;  %s1412_s5 = int_to_ptr.vmem [resolvable:$false] %s1411_s5 }
  0x5e   : > { %v267_v25 = vrot.slane %v263_v14, %v266_v20  ;;  %v279_v27 = vrot.slane %v271_v24, %v266_v20  ;;  %v312_v31 = vrot.slane %v304_v28, %v311_v26  ;;  %v308_v32 = vrot.slane %v304_v28, %v307_v30  ;;  %605 = vperm.xlu1 %1328, %v1739_v43   ;;  %p1408_p4 = scmp.ne.s32.totalorder %s1875_s22, %s1407_s4  ;;  %s1413_s6 = scalar_lea.vmem %s1412_s5, 64 }
  0x5f   : > { %vm199_vm0 = vcmp.eq.s32.totalorder %v1660_v2, %v197_v16  ;;  %vm201_vm1 = vcmp.eq.s32.totalorder %v1667_v8, %v197_v16  ;;  %vm198_vm2 = vcmp.eq.s32.totalorder %v1660_v2, %v193_v17  ;;  %vm200_vm3 = vcmp.eq.s32.totalorder %v1667_v8, %v193_v17  ;;  %p1414_p10 = scmp.lt.s32.totalorder %s1875_s22, %s1412_s5  ;;  %p1415_p13 = scmp.lt.s32.totalorder %s1413_s6, %s1407_s4 }
  0x60   : > { %vm1202_vm4 = vmpackc.low %vm201_vm1, %vm199_vm0  ;;  %vm203_vm5 = vcmp.eq.s32.totalorder %v1670_v12, %v197_v16  ;;  %vm205_vm6 = vcmp.eq.s32.totalorder %v1673_v13, %v197_v16  ;;  %vm202_vm7 = vcmp.eq.s32.totalorder %v1670_v12, %v193_v17  ;;  %vm204_vm8 = vcmp.eq.s32.totalorder %v1673_v13, %v193_v17  ;;  %p1409_p6 = pnand %p1408_p4, %p1600_p12 }
  0x61   : > { %1203 = vmatprep.subr.msk.bf16.mxu0 %vm1202_vm4, %v1484_v21  ;;  %vm1204_vm9 = vmpackc.low %vm200_vm3, %vm198_vm2  ;;  %vm240_vm12 = vcmp.eq.s32.totalorder %v1660_v2, %v238_v22  ;;  %vm242_vm13 = vcmp.eq.s32.totalorder %v1667_v8, %v238_v22  ;;  %vm239_vm15 = vcmp.eq.s32.totalorder %v1660_v2, %v234_v23  ;;  %vm241_vm0 = vcmp.eq.s32.totalorder %v1667_v8, %v234_v23  ;;  %p1416_p3 = por %p1415_p13, %p1414_p10 }
  0x62   : > { %1205 = vmatpush1.bf16.msk.msra.mxu0 %vm1204_vm9, %v1484_v21  ;;  %vm1206_vm10 = vmpackc.low %vm205_vm6, %vm203_vm5  ;;  %vm244_vm1 = vcmp.eq.s32.totalorder %v1670_v12, %v238_v22  ;;  %vm246_vm2 = vcmp.eq.s32.totalorder %v1673_v13, %v238_v22  ;;  %vm243_vm5 = vcmp.eq.s32.totalorder %v1670_v12, %v234_v23  ;;  %vm245_vm6 = vcmp.eq.s32.totalorder %v1673_v13, %v234_v23  ;;  %p1410_p8 = pneg %p1409_p6 }
  0x63   : > { %1207 = vmatprep.subr.msk.bf16.mxu0 %vm1206_vm10, %v1484_v21  ;;  %vm1208_vm11 = vmpackc.low %vm204_vm8, %vm202_vm7  ;;  %v275_v29 = vrot.slane %v267_v25, %v266_v20  ;;  %vm281_vm7 = vcmp.eq.s32.totalorder %v1660_v2, %v279_v27  ;;  %vm283_vm8 = vcmp.eq.s32.totalorder %v1667_v8, %v279_v27  ;;  %v320_v33 = vrot.slane %v312_v31, %v307_v30 }
  0x64   : > { %vm1210_vm14 = vmpackc.low %vm242_vm13, %vm240_vm12  ;;  %vm285_vm13 = vcmp.eq.s32.totalorder %v1670_v12, %v279_v27  ;;  %v316_v34 = vrot.slane %v308_v32, %v307_v30  ;;  %1330 = vset.pattern.permute.xlu1 %v1486_v44  ;;  %1329 = vset.pattern.permute.xlu0 %v1486_v44  ;;  %v1487_v4 = vmov 1   ;;  %v1488_v5 = vmov 3   ;;  %p1417_p7 = pnand %p1416_p3, %p1410_p8 }
  0x65   : > { %vm1212_vm3 = vmpackc.low %vm241_vm0, %vm239_vm15  ;;  %vm282_vm12 = vcmp.eq.s32.totalorder %v1667_v8, %v275_v29  ;;  %637 = vperm.xlu1 %1330, %v1737_v42   ;;  %633 = vperm.xlu0 %1329, %v1731_v39   ;;  %v1489_v6 = vmov 4   ;;  %v1490_v7 = vmov 5  }
  0x66   : > { %1209 = vmatpush1.bf16.msk.msra.mxu0 %vm1208_vm11, %v1484_v21  ;;  %vm1214_vm4 = vmpackc.low %vm246_vm2, %vm244_vm1  ;;  %vm280_vm11 = vcmp.eq.s32.totalorder %v1660_v2, %v275_v29  ;;  %vm284_vm1 = vcmp.eq.s32.totalorder %v1670_v12, %v275_v29  ;;  %vm286_vm2 = vcmp.eq.s32.totalorder %v1673_v13, %v275_v29 }
  0x67   : > { %1211 = vmatprep.subr.msk.bf16.mxu0 %vm1210_vm14, %v1484_v21  ;;  %vm1216_vm9 = vmpackc.low %vm245_vm6, %vm243_vm5  ;;  %vm287_vm14 = vcmp.eq.s32.totalorder %v1673_v13, %v279_v27 }
  0x68   : > { %vm1218_vm10 = vmpackc.low %vm283_vm8, %vm281_vm7  ;;  %vm321_vm7 = vcmp.eq.s32.totalorder %v1660_v2, %v316_v34  ;;  %vm323_vm8 = vcmp.eq.s32.totalorder %v1667_v8, %v316_v34 }
  0x69   : > { %vm1220_vm15 = vmpackc.low %vm282_vm12, %vm280_vm11  ;;  %641 = vperm.xlu1 %1330, %v1733_v40   ;;  %645 = vperm.xlu0 %1329, %v1739_v43  }
  0x6a   : > { %1213 = vmatpush1.bf16.msk.msra.mxu0 %vm1212_vm3, %v1484_v21  ;;  %vm1222_vm0 = vmpackc.low %vm287_vm14, %vm285_vm13  ;;  %vm322_vm3 = vcmp.eq.s32.totalorder %v1660_v2, %v320_v33  ;;  %vm325_vm13 = vcmp.eq.s32.totalorder %v1670_v12, %v316_v34  ;;  %vm327_vm14 = vcmp.eq.s32.totalorder %v1673_v13, %v316_v34 }
  0x6b   : > { %1215 = vmatprep.subr.msk.bf16.mxu0 %vm1214_vm4, %v1484_v21  ;;  %vm324_vm4 = vcmp.eq.s32.totalorder %v1667_v8, %v320_v33  ;;  %vm1224_vm5 = vmpackc.low %vm286_vm2, %vm284_vm1  ;;  %v1491_v8 = vmov 6   ;;  %vm1006_vm1 = vcmp.lt.s32.totalorder %v177_v0, 256 }
  0x6c   : > { %vm1226_vm6 = vmpackc.low %vm324_vm4, %vm322_vm3 }
  0x6d   : > { %vm1228_vm11 = vmpackc.low %vm323_vm8, %vm321_vm7  ;;  %1331 = vset.pattern.permute.xlu1 %v1487_v4  ;;  %1332 = vset.pattern.permute.xlu0 %v1487_v4 }
  0x6e   : > { %1217 = vmatpush1.bf16.msk.msra.mxu0 %vm1216_vm9, %v1484_v21  ;;  %vm326_vm9 = vcmp.eq.s32.totalorder %v1670_v12, %v320_v33  ;;  %669 = vperm.xlu1 %1331, %v1731_v39  }
  0x6f   : > { %1219 = vmatprep.subr.msk.bf16.mxu0 %vm1218_vm10, %v1484_v21  ;;  %vm328_vm10 = vcmp.eq.s32.totalorder %v1673_v13, %v320_v33  ;;  %673 = vperm.xlu0 %1332, %v1737_v42  }
  0x70   : > { %vm1230_vm12 = vmpackc.low %vm328_vm10, %vm326_vm9 }
  0x72   : > { %1221 = vmatpush1.bf16.msk.msra.mxu0 %vm1220_vm15, %v1484_v21  ;;  %vm1232_vm15 = vmpackc.low %vm327_vm14, %vm325_vm13  ;;  %677 = vperm.xlu1 %1331, %v1733_v40  }
  0x73   : > { %1223 = vmatprep.subr.msk.bf16.mxu0 %vm1222_vm0, %v1484_v21  ;;  %vm450_vm0 = vcmask 261120   ;;  %1333 = vset.pattern.permute.xlu0 %v1488_v5 }
  0x74   : > { %804 = vperm.xlu0 %1333, %v1731_v39  }
  0x76   : > { %1225 = vmatpush1.bf16.msk.msra.mxu0 %vm1224_vm5, %v1484_v21  ;;  %681 = vperm.xlu1 %1331, %v1739_v43  }
  0x77   : > { %1227 = vmatprep.subr.msk.bf16.mxu0 %vm1226_vm6, %v1484_v21 }
  0x78   : > { %1336 = vset.pattern.permute.xlu0 %v1489_v6 }
  0x79   : > { %903 = vperm.xlu0 %1336, %v1737_v42  }
  0x7a   : > { %1229 = vmatpush1.bf16.msk.msra.mxu0 %vm1228_vm11, %v1484_v21  ;;  %1334 = vset.pattern.permute.xlu1 %v1488_v5 }
  0x7b   : > { %1231 = vmatprep.subr.msk.bf16.mxu0 %vm1230_vm12, %v1484_v21  ;;  %808 = vperm.xlu1 %1334, %v1737_v42  }
  0x7d   : > { %1337 = vset.pattern.permute.xlu0 %v1490_v7 }
  0x7e   : > { %1233 = vmatpush1.bf16.msk.msra.mxu0 %vm1232_vm15, %v1484_v21  ;;  %941 = vperm.xlu0 %1337, %v1731_v39  }
  0x7f   : > { %1335 = vset.pattern.permute.xlu1 %v1489_v6 }
  0x80   : > { %899 = vperm.xlu1 %1335, %v1731_v39  }
  0x81   : > { %414 = vmatmul.mubr.f32.vlgmr.msra.gmra.mrb[0].mxu0 %v345_v35 }
  0x82   : > { %419 = vmatprep.mubr.f32.mxu0 %v1483_v1  ;;  %1340 = vset.pattern.permute.xlu0 %v1491_v8 }
  0x84   : > { %907 = vperm.xlu1 %1335, %v1733_v40  }
  0x85   : > { %420 = vmatmul.mubr.f32.gmra.mrb[2].mxu0 %v346_v36 }
  0x86   : > { %425 = vmatprep.mubr.f32.mxu0 %v1483_v1 }
  0x88   : > { %911 = vperm.xlu1 %1335, %v1739_v43  }
  0x89   : > { %426 = vmatmul.mubr.f32.gmra.mrb[4].mxu0 %v347_v37 }
  0x8a   : > { %431 = vmatprep.mubr.f32.mxu0 %v1483_v1 }
  0x8c   : > { %1338 = vset.pattern.permute.xlu1 %v1490_v7 }
  0x8d   : > { %432 = vmatmul.mubr.f32.gmra.mrb[6].mxu0 %v348_v38  ;;  %945 = vperm.xlu1 %1338, %v1737_v42  }
  0x8e   : > { %881 = vmatprep.mubr.f32.mxu0 %v1483_v1 }
  0x91   : > { %1339 = vset.pattern.permute.xlu1 %v1491_v8  ;;  %v664_v8 = vld [vmem:[#allocation5 + $0x60] sm:$0xff] }
  0x92   : > { %969 = vperm.xlu1 %1339, %v1731_v39  }
  0xd8   : > { %v591_v9 = vpop.permute.xlu0 %590  ;;  %v601_v18 = vpop.permute.xlu1 %600 }
  0xdc   : > { %v596_v13 = vpop.permute.xlu0 %595 }
  0xdd   : > { %v606_v32 = vpop.permute.xlu1 %605 }
 0x154   : > { %v1747_v45 = vpop.f32.mrb[0].mxu0 }
 0x155   : > { %v1749_v46 = vpop.f32.mrb[1].mxu0 }
 0x158   : > { %v1751_v47 = vpop.f32.mrb[2].mxu0 }
 0x159   : > { %v1753_v48 = vpop.f32.mrb[3].mxu0  ;;  %v1236_v49 = vpack.c.bf16 %v1751_v47, %v1747_v45 }
 0x15a   : > { %v1234_v50 = vpack.c.bf16 %v1753_v48, %v1749_v46 }
 0x15c   : > { %v1759_v51 = vpop.f32.mrb[4].mxu0  ;;  %1235 = vmatprep.subr.bf16.mxu1 %v1234_v50  ;;  %v634_v50 = vpop.permute.xlu0 %633 }
 0x15d   : > { %v1761_v52 = vpop.f32.mrb[5].mxu0  ;;  %1237 = vmatpush1.bf16.msra.mxu1 %v1236_v49 }
 0x160   : > { %v1763_v53 = vpop.f32.mrb[6].mxu0 }
 0x161   : > { %v1765_v54 = vpop.f32.mrb[7].mxu0  ;;  %v1240_v55 = vpack.c.bf16 %v1763_v53, %v1759_v51 }
 0x162   : > { %v1238_v56 = vpack.c.bf16 %v1765_v54, %v1761_v52 }
 0x164   : > { %1239 = vmatprep.subr.bf16.mxu1 %v1238_v56 }
 0x165   : > { %1241 = vmatpush1.bf16.msra.mxu1 %v1240_v55 }
 0x168   : > { %1179 = vmatmul.mubr.msk.f32.vlgmr.msra.gmra.mrb[0].mxu1 %vm450_vm0, %v442_v57 }
 0x169   : > { %545 = vmatprep.mubr.f32.mxu1 %v1483_v1 }
 0x16c   : > { %1180 = vmatmul.mubr.msk.f32.gmra.mrb[2].mxu1 %vm450_vm0, %v443_v58  ;;  %v638_v58 = vpop.permute.xlu1 %637 }
 0x16d   : > { %551 = vmatprep.mubr.f32.mxu1 %v1483_v1 }
 0x170   : > { %1181 = vmatmul.mubr.msk.f32.gmra.mrb[4].mxu1 %vm450_vm0, %v444_v59 }
 0x171   : > { %557 = vmatprep.mubr.f32.mxu1 %v1483_v1 }
 0x174   : > { %1182 = vmatmul.mubr.msk.f32.gmra.mrb[6].mxu1 %vm450_vm0, %v445_v60 }
 0x175   : > { %563 = vmatprep.mubr.f32.mxu1 %v1483_v1 }
 0x178   : > { %1183 = vmatmul.mubr.msk.f32.gmra.mrb[8].mxu1 %vm450_vm0, %v446_v61 }
 0x179   : > { %569 = vmatprep.mubr.f32.mxu1 %v1483_v1 }
 0x17c   : > { %1184 = vmatmul.mubr.msk.f32.gmra.mrb[10].mxu1 %vm450_vm0, %v447_v62 }
 0x17d   : > { %575 = vmatprep.mubr.f32.mxu1 %v1483_v1 }
 0x180   : > { %1185 = vmatmul.mubr.msk.f32.gmra.mrb[12].mxu1 %vm450_vm0, %v448_v63 }
 0x181   : > { %581 = vmatprep.mubr.f32.mxu1 %v1483_v1 }
 0x184   : > { %1186 = vmatmul.mubr.msk.f32.gmra.mrb[14].mxu1 %vm450_vm0, %v449_v3 }
 0x185   : > { %760 = vmatprep.mubr.f32.mxu1 %v1483_v1 }
 0x23b   : > { %v541_v10 = vpop.f32.mrb[0].mxu1 }
 0x23c   : > { %v608_v11 = vadd.f32 %v591_v9, %v541_v10  ;;  %v543_v12 = vpop.f32.mrb[1].mxu1 }
 0x23d   : > { %v609_v14 = vadd.f32 %v591_v9, %v543_v12  ;;  %v642_v12 = vpop.permute.xlu1 %641 }
 0x23e   : > { %v616_v15 = vmul.f32 %v608_v11, %v1747_v45 }
 0x23f   : > { %v617_v16 = vmul.f32 %v609_v14, %v1749_v46  ;;  %v547_v17 = vpop.f32.mrb[2].mxu1 }
 0x240   : > { %v1803_v19 = vadd.f32 %v616_v15, %v1747_v45  ;;  %v610_v20 = vadd.f32 %v596_v13, %v547_v17  ;;  %v549_v21 = vpop.f32.mrb[3].mxu1  ;;  %v665_v17 = vld [vmem:[#allocation5 + $0x68] sm:$0xff] }
 0x241   : > { %v1806_v22 = vadd.f32 %v617_v16, %v1749_v46  ;;  %v611_v23 = vadd.f32 %v596_v13, %v549_v21  ;;  %v646_v21 = vpop.permute.xlu0 %645 }
 0x242   : > { %v618_v24 = vmul.f32 %v610_v20, %v1751_v47 }
 0x243   : > { %v619_v25 = vmul.f32 %v611_v23, %v1753_v48  ;;  %v553_v26 = vpop.f32.mrb[4].mxu1 }
 0x244   : > { %v1811_v27 = vadd.f32 %v618_v24, %v1751_v47  ;;  %v612_v28 = vadd.f32 %v601_v18, %v553_v26  ;;  %v555_v29 = vpop.f32.mrb[5].mxu1 }
 0x245   : > { %v1814_v30 = vadd.f32 %v619_v25, %v1753_v48  ;;  %v613_v31 = vadd.f32 %v601_v18, %v555_v29  ;;  %v666_v29 = vld [vmem:[#allocation5 + $0x70] sm:$0xff] }
 0x246   : > { %v620_v33 = vmul.f32 %v612_v28, %v1759_v51  ;;  %v1244_v37 = vpack.c.bf16 %v1811_v27, %v1803_v19 }
 0x247   : > { %v621_v34 = vmul.f32 %v613_v31, %v1761_v52  ;;  %v559_v35 = vpop.f32.mrb[6].mxu1  ;;  %v1242_v36 = vpack.c.bf16 %v1814_v30, %v1806_v22 }
 0x248   : > { %v1823_v38 = vadd.f32 %v620_v33, %v1759_v51  ;;  %v614_v39 = vadd.f32 %v606_v32, %v559_v35  ;;  %v561_v40 = vpop.f32.mrb[7].mxu1  ;;  %v667_v35 = vld [vmem:[#allocation5 + $0x78] sm:$0xff] }
 0x249   : > { %v1826_v41 = vadd.f32 %v621_v34, %v1761_v52  ;;  %v615_v42 = vadd.f32 %v606_v32, %v561_v40  ;;  %1243 = vmatprep.subr.bf16.mxu1 %v1242_v36  ;;  %v801_v36 = vld [vmem:[#allocation5 + $0x80] sm:$0xff] }
 0x24a   : > { %v622_v43 = vmul.f32 %v614_v39, %v1763_v53  ;;  %1245 = vmatpush1.bf16.msra.mxu1 %v1244_v37  ;;  %v802_v37 = vld [vmem:[#allocation5 + $0x88] sm:$0xff]  ;;  %v670_v39 = vpop.permute.xlu1 %669 }
 0x24b   : > { %v623_v44 = vmul.f32 %v615_v42, %v1765_v54  ;;  %v565_v49 = vpop.f32.mrb[8].mxu1 }
 0x24c   : > { %v1831_v55 = vadd.f32 %v622_v43, %v1763_v53  ;;  %v567_v56 = vpop.f32.mrb[9].mxu1  ;;  %v648_v59 = vadd.f32 %v634_v50, %v565_v49  ;;  %v674_v43 = vpop.permute.xlu0 %673 }
 0x24d   : > { %v1834_v57 = vadd.f32 %v623_v44, %v1765_v54  ;;  %v649_v62 = vadd.f32 %v634_v50, %v567_v56 }
 0x24e   : > { %v1248_v63 = vpack.c.bf16 %v1831_v55, %v1823_v38  ;;  %v656_v7 = vmax.f32 %v648_v59, 0.0  ;;  %v678_v40 = vpop.permute.xlu1 %677 }
 0x24f   : > { %v1246_v60 = vpack.c.bf16 %v1834_v57, %v1826_v41  ;;  %v571_v61 = vpop.f32.mrb[10].mxu1  ;;  %v657_v9 = vmax.f32 %v649_v62, 0.0 }
 0x250   : > { %v650_v3 = vadd.f32 %v638_v58, %v571_v61  ;;  %v573_v4 = vpop.f32.mrb[11].mxu1  ;;  %v805_v59 = vpop.permute.xlu0 %804 }
 0x251   : > { %1247 = vmatprep.subr.bf16.mxu1 %v1246_v60  ;;  %v651_v5 = vadd.f32 %v638_v58, %v573_v4 }
 0x252   : > { %1249 = vmatpush1.bf16.msra.mxu1 %v1248_v63  ;;  %v658_v6 = vmax.f32 %v650_v3, 0.0  ;;  %v682_v42 = vpop.permute.xlu1 %681 }
 0x253   : > { %v659_v10 = vmax.f32 %v651_v5, 0.0  ;;  %v577_v11 = vpop.f32.mrb[12].mxu1 }
 0x254   : > { %v1252_v13 = vpack.c.bf16 %v658_v6, %v656_v7  ;;  %v579_v14 = vpop.f32.mrb[13].mxu1  ;;  %v652_v16 = vadd.f32 %v642_v12, %v577_v11 }
 0x255   : > { %v1250_v15 = vpack.c.bf16 %v659_v10, %v657_v9  ;;  %1187 = vmatmul.mubr.msk.f32.vlgmr.msra.gmra.mrb[16].mxu1 %vm450_vm0, %v664_v8  ;;  %v653_v20 = vadd.f32 %v642_v12, %v579_v14  ;;  %v904_v10 = vpop.permute.xlu0 %903 }
 0x256   : > { %766 = vmatprep.mubr.f32.mxu1 %v1483_v1  ;;  %v660_v26 = vmax.f32 %v652_v16, 0.0  ;;  %v809_v44 = vpop.permute.xlu1 %808 }
 0x257   : > { %v583_v18 = vpop.f32.mrb[14].mxu1  ;;  %1251 = vmatprep.subr.bf16.mxu0 %v1250_v15  ;;  %v661_v31 = vmax.f32 %v653_v20, 0.0 }
 0x258   : > { %v654_v23 = vadd.f32 %v646_v21, %v583_v18  ;;  %v585_v24 = vpop.f32.mrb[15].mxu1  ;;  %1253 = vmatpush1.bf16.msra.mxu0 %v1252_v13 }
 0x259   : > { %v655_v25 = vadd.f32 %v646_v21, %v585_v24  ;;  %1188 = vmatmul.mubr.msk.f32.gmra.mrb[18].mxu1 %vm450_vm0, %v665_v17 }
 0x25a   : > { %v662_v28 = vmax.f32 %v654_v23, 0.0  ;;  %772 = vmatprep.mubr.f32.mxu1 %v1483_v1  ;;  %v900_v63 = vpop.permute.xlu1 %899 }
 0x25b   : > { %v663_v32 = vmax.f32 %v655_v25, 0.0 }
 0x25c   : > { %v1256_v33 = vpack.c.bf16 %v662_v28, %v660_v26 }
 0x25d   : > { %v1254_v34 = vpack.c.bf16 %v663_v32, %v661_v31  ;;  %1189 = vmatmul.mubr.msk.f32.gmra.mrb[20].mxu1 %vm450_vm0, %v666_v29 }
 0x25e   : > { %778 = vmatprep.mubr.f32.mxu1 %v1483_v1  ;;  %v908_v14 = vpop.permute.xlu1 %907 }
 0x25f   : > { %1255 = vmatprep.subr.bf16.mxu0 %v1254_v34 }
 0x260   : > { %1257 = vmatpush1.bf16.msra.mxu0 %v1256_v33 }
 0x261   : > { %1190 = vmatmul.mubr.msk.f32.gmra.mrb[22].mxu1 %vm450_vm0, %v667_v35 }
 0x262   : > { %v912_v33 = vpop.permute.xlu1 %911 }
 0x263   : > { %1191 = vmatmul.mubr.msk.f32.vlgmr.msra.gmra.mrb[8].mxu0 %vm450_vm0, %v801_v36 }
 0x264   : > { %887 = vmatprep.mubr.f32.mxu0 %v1483_v1 }
 0x267   : > { %1192 = vmatmul.mubr.msk.f32.gmra.mrb[10].mxu0 %vm450_vm0, %v802_v37 }
 0x328   : > { %v762_v49 = vpop.f32.mrb[16].mxu1 }
 0x329   : > { %v763_v50 = vadd.f32 %v762_v49, %v670_v39  ;;  %v764_v56 = vpop.f32.mrb[17].mxu1 }
 0x32a   : > { %v765_v58 = vadd.f32 %v764_v56, %v670_v39  ;;  %v942_v56 = vpop.permute.xlu0 %941 }
 0x32b   : > { %v785_v60 = vmul.f32 %v763_v50, %v1747_v45  ;;  %v946_v50 = vpop.permute.xlu1 %945 }
 0x32c   : > { %v786_v61 = vmul.f32 %v765_v58, %v1749_v46  ;;  %v768_v62 = vpop.f32.mrb[18].mxu1 }
 0x32d   : > { %v769_v1 = vadd.f32 %v768_v62, %v674_v43  ;;  %v770_v3 = vpop.f32.mrb[19].mxu1  ;;  %v793_v6 = vadd.f32 %v785_v60, %v1803_v19 }
 0x32e   : > { %v771_v4 = vadd.f32 %v770_v3, %v674_v43  ;;  %v794_v8 = vadd.f32 %v786_v61, %v1806_v22 }
 0x32f   : > { %v787_v5 = vmul.f32 %v769_v1, %v1751_v47  ;;  %v914_v15 = vmul.f32 %v900_v63, %v793_v6 }
 0x330   : > { %v788_v7 = vmul.f32 %v771_v4, %v1753_v48  ;;  %v774_v9 = vpop.f32.mrb[20].mxu1  ;;  %v915_v17 = vmul.f32 %v900_v63, %v794_v8 }
 0x331   : > { %v775_v11 = vadd.f32 %v774_v9, %v678_v40  ;;  %v776_v12 = vpop.f32.mrb[21].mxu1  ;;  %v795_v45 = vadd.f32 %v787_v5, %v1811_v27 }
 0x332   : > { %v777_v46 = vadd.f32 %v776_v12, %v678_v40  ;;  %v796_v13 = vadd.f32 %v788_v7, %v1814_v30 }
 0x333   : > { %v789_v16 = vmul.f32 %v775_v11, %v1759_v51  ;;  %v916_v47 = vmul.f32 %v904_v10, %v795_v45 }
 0x334   : > { %v790_v19 = vmul.f32 %v777_v46, %v1761_v52  ;;  %v917_v48 = vmul.f32 %v904_v10, %v796_v13  ;;  %v780_v18 = vpop.f32.mrb[22].mxu1 }
 0x335   : > { %v922_v22 = vadd.f32 %v916_v47, %v914_v15  ;;  %v781_v20 = vadd.f32 %v780_v18, %v682_v42  ;;  %v782_v21 = vpop.f32.mrb[23].mxu1  ;;  %v797_v23 = vadd.f32 %v789_v16, %v1823_v38 }
 0x336   : > { %v931_v24 = vadd.f32 %v917_v48, %v915_v17  ;;  %v783_v27 = vadd.f32 %v782_v21, %v682_v42  ;;  %v798_v25 = vadd.f32 %v790_v19, %v1826_v41  ;;  %v883_v30 = vpop.f32.mrb[8].mxu0 }
 0x337   : > { %v791_v26 = vmul.f32 %v781_v20, %v1763_v53  ;;  %v918_v28 = vmul.f32 %v908_v14, %v797_v23  ;;  %v884_v51 = vadd.f32 %v883_v30, %v805_v59  ;;  %v885_v29 = vpop.f32.mrb[9].mxu0 }
 0x338   : > { %v792_v31 = vmul.f32 %v783_v27, %v1765_v54  ;;  %v919_v52 = vmul.f32 %v908_v14, %v798_v25  ;;  %v886_v32 = vadd.f32 %v885_v29, %v805_v59 }
 0x339   : > { %v923_v34 = vadd.f32 %v922_v22, %v918_v28  ;;  %v799_v35 = vadd.f32 %v791_v26, %v1831_v55  ;;  %v894_v39 = vmax.f32 %v884_v51, 0.0  ;;  %v970_v22 = vpop.permute.xlu1 %969 }
 0x33a   : > { %v932_v36 = vadd.f32 %v931_v24, %v919_v52  ;;  %v800_v38 = vadd.f32 %v792_v31, %v1834_v57  ;;  %v889_v37 = vpop.f32.mrb[10].mxu0  ;;  %v895_v53 = vmax.f32 %v886_v32, 0.0  ;;  %v1492_v52 = vmov 1966171168  }
 0x33b   : > { %v920_v41 = vmul.f32 %v912_v33, %v799_v35  ;;  %v890_v40 = vadd.f32 %v889_v37, %v809_v44  ;;  %v891_v42 = vpop.f32.mrb[11].mxu0  ;;  %v948_v55 = vmul.f32 %v942_v56, %v894_v39  ;;  %v990_v32 = vunpack.c.l.s4 %v1492_v52 }
 0x33c   : > { %v921_v43 = vmul.f32 %v912_v33, %v800_v38  ;;  %v892_v49 = vadd.f32 %v891_v42, %v809_v44  ;;  %v949_v57 = vmul.f32 %v942_v56, %v895_v53 }
 0x33d   : > { %v924_v54 = vadd.f32 %v923_v34, %v920_v41  ;;  %v896_v58 = vmax.f32 %v890_v40, 0.0  ;;  %v991_v33 = vunpack.c.0.s8 %v990_v32 }
 0x33e   : > { %v933_v59 = vadd.f32 %v932_v36, %v921_v43  ;;  %v897_v60 = vmax.f32 %v892_v49, 0.0 }
 0x33f   : > { %v925_v61 = vrot.slane %v924_v54, 4  ;;  %v950_v62 = vmul.f32 %v946_v50, %v896_v58  ;;  %v994_v35 = vsub.s32 %v991_v33, %v1660_v2 }
 0x340   : > { %v934_v63 = vrot.slane %v933_v59, 4  ;;  %v951_v1 = vmul.f32 %v946_v50, %v897_v60 }
 0x341   : > { %v926_v3 = vadd.f32 %v925_v61, %v924_v54  ;;  %v952_v4 = vadd.f32 %v950_v62, %v948_v55 }
 0x342   : > { %v935_v5 = vadd.f32 %v934_v63, %v933_v59  ;;  %v959_v6 = vadd.f32 %v951_v1, %v949_v57 }
 0x343   : > { %v927_v7 = vrot.slane %v926_v3, 2  ;;  %v953_v8 = vrot.slane %v952_v4, 4 }
 0x344   : > { %v936_v9 = vrot.slane %v935_v5, 2  ;;  %v960_v44 = vrot.slane %v959_v6, 4 }
 0x345   : > { %v954_v10 = vadd.f32 %v953_v8, %v952_v4  ;;  %v928_v11 = vadd.f32 %v927_v7, %v926_v3 }
 0x346   : > { %v961_v12 = vadd.f32 %v960_v44, %v959_v6  ;;  %v937_v45 = vadd.f32 %v936_v9, %v935_v5 }
 0x347   : > { %v955_v46 = vrot.slane %v954_v10, 2  ;;  %v929_v14 = vrot.slane %v928_v11, 1 }
 0x348   : > { %v962_v13 = vrot.slane %v961_v12, 2  ;;  %v938_v16 = vrot.slane %v937_v45, 1 }
 0x349   : > { %v956_v15 = vadd.f32 %v955_v46, %v954_v10  ;;  %v930_v48 = vadd.f32 %v929_v14, %v928_v11 }
 0x34a   : > { %v963_v47 = vadd.f32 %v962_v13, %v961_v12  ;;  %v939_v20 = vadd.f32 %v938_v16, %v937_v45 }
 0x34b   : > { %v957_v17 = vrot.slane %v956_v15, 1 }
 0x34c   : > { %v964_v19 = vrot.slane %v963_v47, 1 }
 0x34d   : > { %v958_v18 = vadd.f32 %v957_v17, %v956_v15 }
 0x34e   : > { %v965_v21 = vadd.f32 %v964_v19, %v963_v47 }
 0x34f   : > { %v966_v23 = vadd.f32 %v958_v18, %v930_v48 }
 0x350   : > { %v967_v24 = vadd.f32 %v965_v21, %v939_v20 }
 0x351   : > { %v972_v27 = vadd.f32 %v970_v22, %v966_v23 }
 0x352   : > { %v973_v25 = vadd.f32 %v970_v22, %v967_v24 }
 0x353   : > { %v1193_v30 = vmul.f32 -1.442695, %v972_v27 }
 0x354   : > { %v1194_v26 = vmul.f32 -1.442695, %v973_v25 }
 0x355   : > { %1341 = vpow2.f32 %v1193_v30 }
 0x356   : > { %1343 = vpow2.f32 %v1194_v26 }
 0x35f   : > { %v1342_v28 = vpop.eup %1341 }
 0x360   : > { %v1344_v51 = vpop.eup %1343  ;;  %v980_v29 = vadd.f32 1.0, %v1342_v28 }
 0x361   : > { %v981_v31 = vadd.f32 1.0, %v1344_v51 }
 0x362   : > { %1345 = vrcp.f32 %v980_v29 }
 0x363   : > { %1347 = vrcp.f32 %v981_v31 }
 0x36c   : > { %v1346_v34 = vpop.eup %1345 }
 0x36d   : > { %v1348_v36 = vpop.eup %1347 }
 0x36e   : > { %v988_v38 = vcombine.low %v1346_v34, %v1348_v36 }
 0x370   : > { %v995_v37 = vrot.slane %v988_v38, %v994_v35 }
 0x372   : > { %v1002_v39 = vrot.slane %v995_v37, %v994_v35 }
 0x374   : > { %1008 = vst.msk [vmem:[%s174_s27] sm:$0x3] %vm1006_vm1, %v1002_v39 }
 0x375   : > { %1420 = shalt.err (!%p1417_p7)
}
 0x376   : > { %s1421_s7 = scalar_lea.hbm %s1873_s30, 32  ;;  %s1425_s25 = scalar_lea.hbm %s1919_s2, 64 }
 0x377   : > { %p1422_p9 = scmp.ne.s32.totalorder %s1873_s30, %s1421_s7  ;;  %p1426_p0 = scmp.lt.u32.totalorder %s1873_s30, %s1919_s2 }
 0x378   : > { %p1427_p1 = scmp.lt.u32.totalorder %s1425_s25, %s1421_s7  ;;  %p1429_p4 = scmp.lt.u32.totalorder %s1421_s7, %s1873_s30 }
 0x379   : > { %p1423_p2 = pnand %p1422_p9, %p1600_p12 }
 0x37a   : > { %p1428_p11 = por %p1427_p1, %p1426_p0 }
 0x37b   : > { %p1424_p5 = pneg %p1423_p2 }
 0x37c   : > { %p1430_p6 = por %p1429_p4, %p1428_p11 }
 0x37e   : > { %p1431_p8 = pnand %p1430_p6, %p1424_p5 }
 0x380   : > { %1434 = shalt.err (!%p1431_p8)
}
 0x381   : > { %1264 = dma.vmem_to_hbm [thread:$0]  (%p1600_p12), %s1875_s22, 32, %s1873_s30, %s1010_s3  }
 0x382 PF: > { %s1036_s19 = sand.u32 1, %s1465_s9   ;;  %p1934_p10 = scmp.ne.s32.totalorder %s1924_s16, 0 }
 0x383   : > { %p1935_p13 = scmp.ge.s32.totalorder %s1477_s12, 2  ;;  %s1037_s29 = scalar_lea.sflag [#allocation4], %s1036_s19 }
 0x385   : > { %p1275_p3 = pnand %p1935_p13, %p1934_p10 }
 0x387   : > { %1460 = dma.done.wait (!%p1275_p3), %s1037_s29, 32  }
 0x388   : > { %1462 = vsyncadd (!%p1275_p3), %s1037_s29, 4294967264  ;;  %p16_p7 = scmp.ge.s32.totalorder %s1565_s21, 4   ;;  %s1936_s9 = smov %s1469_s10 }
 0x389   : > { %s1937_s10 = smov %s1473_s11  ;;  %s1938_s11 = smov %s1596_s8 }
 0x38a   : > { %s1939_s12 = smov %s1565_s21  ;;  %18 = sbr.rel (!%p16_p7) target bundleno = 6 (0x6), region = 77 }
 0x391   :  { %1042 = vsyncpa [#allocation3], 1 }
 0x392   :  { %1044 = vsyncpa [#allocation3 + $0x1], 1 }
 0x393   :  { %1045 = vsyncpa [#allocation6], 1 }
 0x394   :  { %1046 = vsyncpa [#allocation4], 1 }
 0x395   :  { %1048 = vsyncpa [#allocation4 + $0x1], 1 }

</bundles_post_ra>
